<compile_context>
chip_gen: v7x
topology: tpu7x:2x2x1
jax: 0.10.0
libtpu: 0.0.40
codegen_flags: <defaults>
</compile_context>

<pallas_src>
import functools
import math

import jax
import jax.numpy as jnp
from jax.experimental import pallas as pl
from jax.experimental.pallas import tpu as pltpu


# ----------------------------- helpers ------------------------------------- #

def _pick_tile(dim, cap, align):
    """Largest tile <= cap that divides dim and is a multiple of align, else full dim."""
    if dim <= cap:
        return dim
    t = cap
    while t >= align:
        if dim % t == 0:
            return t
        t //= 2
    return dim


def _gelu(x):
    # tanh-approx GELU (f32 math; v5e has no bf16 VPU/EUP path).
    return 0.5 * x * (1.0 + jnp.tanh(0.7978845608028654 * (x + 0.044715 * x * x * x)))


_VMEM_LIMIT = 48 * 1024 * 1024  # < v7x physical 64 MiB, plenty of pipeline headroom


# ----------------------------- Pallas kernels ------------------------------ #

def _linear_kernel(x_ref, w_ref, b_ref, o_ref, acc_ref):
    @pl.when(pl.program_id(2) == 0)
    def _():
        acc_ref[...] = jnp.zeros_like(acc_ref)

    acc_ref[...] += jnp.dot(x_ref[...], w_ref[...], preferred_element_type=jnp.float32)

    @pl.when(pl.program_id(2) == pl.num_programs(2) - 1)
    def _():
        o_ref[...] = (acc_ref[...] + b_ref[...]).astype(o_ref.dtype)


def linear(x, w, b, out_dtype=jnp.float32, tm_cap=256, tn_cap=256, tk_cap=512):
    """y = x @ w + b, tiled/pipelined, bf16 MXU inputs, f32 accumulation."""
    M, K = x.shape
    N = w.shape[1]
    tm = _pick_tile(M, tm_cap, 8)
    tn = _pick_tile(N, tn_cap, 128)
    tk = _pick_tile(K, tk_cap, 128)
    return pl.pallas_call(
        _linear_kernel,
        out_shape=jax.ShapeDtypeStruct((M, N), out_dtype),
        grid=(M // tm, N // tn, K // tk),
        in_specs=[
            pl.BlockSpec((tm, tk), lambda i, j, k: (i, k)),
            pl.BlockSpec((tk, tn), lambda i, j, k: (k, j)),
            pl.BlockSpec((1, tn), lambda i, j, k: (0, j)),
        ],
        out_specs=pl.BlockSpec((tm, tn), lambda i, j, k: (i, j)),
        scratch_shapes=[pltpu.VMEM((tm, tn), jnp.float32)],
        compiler_params=pltpu.CompilerParams(
            dimension_semantics=("parallel", "parallel", "arbitrary"),
            vmem_limit_bytes=_VMEM_LIMIT),
    )(x.astype(jnp.bfloat16), w.astype(jnp.bfloat16),
      b.reshape(1, N).astype(jnp.float32))


def _ffn_kernel(x_ref, iw_ref, ib_ref, ow_ref, ob_ref, o_ref, acc_ref):
    @pl.when(pl.program_id(1) == 0)
    def _():
        acc_ref[...] = jnp.zeros_like(acc_ref)

    h = jnp.dot(x_ref[...], iw_ref[...], preferred_element_type=jnp.float32) + ib_ref[...]
    h = _gelu(h)
    acc_ref[...] += jnp.dot(h.astype(jnp.bfloat16), ow_ref[...],
                            preferred_element_type=jnp.float32)

    @pl.when(pl.program_id(1) == pl.num_programs(1) - 1)
    def _():
        o_ref[...] = (acc_ref[...] + ob_ref[...]).astype(o_ref.dtype)


def ffn(x, i_w, i_b, o_w, o_b, tm_cap=256, ti_cap=512):
    """Fused gelu(x @ i_w + i_b) @ o_w + o_b; [M, I] intermediate never hits HBM."""
    M, H = x.shape
    I = i_w.shape[1]
    tm = _pick_tile(M, tm_cap, 8)
    ti = _pick_tile(I, ti_cap, 128)
    return pl.pallas_call(
        _ffn_kernel,
        out_shape=jax.ShapeDtypeStruct((M, H), jnp.float32),
        grid=(M // tm, I // ti),
        in_specs=[
            pl.BlockSpec((tm, H), lambda m, i: (m, 0)),
            pl.BlockSpec((H, ti), lambda m, i: (0, i)),
            pl.BlockSpec((1, ti), lambda m, i: (0, i)),
            pl.BlockSpec((ti, H), lambda m, i: (i, 0)),
            pl.BlockSpec((1, H), lambda m, i: (0, 0)),
        ],
        out_specs=pl.BlockSpec((tm, H), lambda m, i: (m, 0)),
        scratch_shapes=[pltpu.VMEM((tm, H), jnp.float32)],
        compiler_params=pltpu.CompilerParams(
            dimension_semantics=("parallel", "arbitrary"),
            vmem_limit_bytes=_VMEM_LIMIT),
    )(x.astype(jnp.bfloat16), i_w.astype(jnp.bfloat16),
      i_b.reshape(1, I).astype(jnp.float32),
      o_w.astype(jnp.bfloat16), o_b.reshape(1, H).astype(jnp.float32))


def _ln_core(x, g, b, o_ref):
    mean = jnp.mean(x, axis=-1, keepdims=True)
    var = jnp.mean(jnp.square(x - mean), axis=-1, keepdims=True)
    y = (x - mean) * jax.lax.rsqrt(var + 1e-12)
    o_ref[...] = (y * g + b).astype(o_ref.dtype)


def _layernorm_kernel(x_ref, g_ref, b_ref, o_ref):
    _ln_core(x_ref[...].astype(jnp.float32), g_ref[...], b_ref[...], o_ref)


def _add_layernorm_kernel(a_ref, r_ref, g_ref, b_ref, o_ref):
    x = a_ref[...].astype(jnp.float32) + r_ref[...].astype(jnp.float32)
    _ln_core(x, g_ref[...], b_ref[...], o_ref)


def layernorm(x, g, b, tm_cap=1024):
    M, H = x.shape
    tm = _pick_tile(M, tm_cap, 8)
    return pl.pallas_call(
        _layernorm_kernel,
        out_shape=jax.ShapeDtypeStruct((M, H), jnp.float32),
        grid=(M // tm,),
        in_specs=[pl.BlockSpec((tm, H), lambda i: (i, 0)),
                  pl.BlockSpec((1, H), lambda i: (0, 0)),
                  pl.BlockSpec((1, H), lambda i: (0, 0))],
        out_specs=pl.BlockSpec((tm, H), lambda i: (i, 0)),
        compiler_params=pltpu.CompilerParams(dimension_semantics=("parallel",)),
    )(x, g.reshape(1, H), b.reshape(1, H))


def add_layernorm(a, r, g, b, tm_cap=1024):
    """LayerNorm(a + r) with the residual add fused into the kernel."""
    M, H = a.shape
    tm = _pick_tile(M, tm_cap, 8)
    return pl.pallas_call(
        _add_layernorm_kernel,
        out_shape=jax.ShapeDtypeStruct((M, H), jnp.float32),
        grid=(M // tm,),
        in_specs=[pl.BlockSpec((tm, H), lambda i: (i, 0)),
                  pl.BlockSpec((tm, H), lambda i: (i, 0)),
                  pl.BlockSpec((1, H), lambda i: (0, 0)),
                  pl.BlockSpec((1, H), lambda i: (0, 0))],
        out_specs=pl.BlockSpec((tm, H), lambda i: (i, 0)),
        compiler_params=pltpu.CompilerParams(dimension_semantics=("parallel",)),
    )(a, r, g.reshape(1, H), b.reshape(1, H))


def _attn_kernel(qkv_ref, m_ref, o_ref, *, num_heads, head_dim, scale):
    """All heads of one batch element; reads the fused (S, 3H) QKV slab directly and
    writes a lane-dense (S, H) context slab."""
    H = num_heads * head_dim
    qkv = qkv_ref[0]                         # (S, 3H) bf16
    mask = m_ref[0]                          # (1, S) f32 additive key mask
    for h in range(num_heads):
        q = qkv[:, h * head_dim:(h + 1) * head_dim]
        k = qkv[:, H + h * head_dim:H + (h + 1) * head_dim]
        v = qkv[:, 2 * H + h * head_dim:2 * H + (h + 1) * head_dim]
        s = jax.lax.dot_general(q, k, (((1,), (1,)), ((), ())),
                                preferred_element_type=jnp.float32)
        s = s * scale + mask                 # (S, S)
        s = s - jnp.max(s, axis=-1, keepdims=True)
        p = jnp.exp(s)
        p = p * pl.reciprocal(jnp.sum(p, axis=-1, keepdims=True), approx=True)
        ctx_h = jnp.dot(p.astype(jnp.bfloat16), v, preferred_element_type=jnp.float32)
        o_ref[0, :, h * head_dim:(h + 1) * head_dim] = ctx_h.astype(o_ref.dtype)


def attention(qkv, mask_add, num_heads):
    """qkv: (B, S, 3H) bf16 (fused projection), mask_add: (B, 1, S) f32 -> (B, S, H) f32."""
    B, S, H3 = qkv.shape
    H = H3 // 3
    dh = H // num_heads
    scale = 1.0 / math.sqrt(dh)
    return pl.pallas_call(
        functools.partial(_attn_kernel, num_heads=num_heads, head_dim=dh, scale=scale),
        out_shape=jax.ShapeDtypeStruct((B, S, H), jnp.float32),
        grid=(B,),
        in_specs=[pl.BlockSpec((1, S, H3), lambda b: (b, 0, 0)),
                  pl.BlockSpec((1, 1, S), lambda b: (b, 0, 0))],
        out_specs=pl.BlockSpec((1, S, H), lambda b: (b, 0, 0)),
        compiler_params=pltpu.CompilerParams(dimension_semantics=("parallel",)),
    )(qkv, mask_add)


def _pool_kernel(p_ref, h_ref, inv_ref, o_ref):
    acc = jnp.dot(p_ref[0], h_ref[0], preferred_element_type=jnp.float32)   # (W, H)
    o_ref[0] = (acc * inv_ref[0]).astype(o_ref.dtype)


def word_pool(pool_mat, hidden, inv_len):
    """pool_mat: (B, W, S) binary bf16; hidden: (B, S, H) bf16; inv_len: (B, W, 1) f32."""
    B, W, S = pool_mat.shape
    H = hidden.shape[-1]
    return pl.pallas_call(
        _pool_kernel,
        out_shape=jax.ShapeDtypeStruct((B, W, H), jnp.float32),
        grid=(B,),
        in_specs=[pl.BlockSpec((1, W, S), lambda b: (b, 0, 0)),
                  pl.BlockSpec((1, S, H), lambda b: (b, 0, 0)),
                  pl.BlockSpec((1, W, 1), lambda b: (b, 0, 0))],
        out_specs=pl.BlockSpec((1, W, H), lambda b: (b, 0, 0)),
        compiler_params=pltpu.CompilerParams(dimension_semantics=("parallel",)),
    )(pool_mat, hidden, inv_len)


# ----------------------------- model (glue) -------------------------------- #

def bert_layer(h2d, mask_add, p, cfg, B, S):
    H = cfg["hidden"]
    nH = cfg["num_heads"]

    # Fused Q|K|V projection (one HBM read of the activations, wide lane-dense output).
    qkv = linear(h2d, p["qkv_w"], p["qkv_b"], out_dtype=jnp.bfloat16)       # (B*S, 3H)
    ctx = attention(qkv.reshape(B, S, 3 * H), mask_add, nH)                 # (B, S, H)

    attn_out = linear(ctx.reshape(B * S, H), p["ao_w"], p["ao_b"])          # (B*S, H) f32
    h1 = add_layernorm(attn_out, h2d, p["ln1_g"], p["ln1_b"])

    ffn_out = ffn(h1, p["i_w"], p["i_b"], p["o_w"], p["o_b"])               # fused FFN
    return add_layernorm(ffn_out, h1, p["ln2_g"], p["ln2_b"])


def word_bert_forward(params, input_ids, attention_mask, wdlens, cfg):
    """input_ids [B, tk_seq+1], attention_mask [B, tk_seq+1] or None, wdlens [B, wd_seq]
       -> [B, wd_seq, hidden]"""
    B, S = input_ids.shape
    H = cfg["hidden"]

    # Embeddings (gather is glue; LayerNorm is a Pallas kernel).
    word_emb = jnp.take(params["word_emb"], input_ids, axis=0)              # (B, S, H)
    pos_emb = params["pos_emb"][:S][None, :, :]
    type_emb = params["type_emb"][0][None, None, :]                         # token_type_ids == 0
    h = (word_emb + pos_emb + type_emb).reshape(B * S, H)
    h = layernorm(h, params["emb_ln_g"], params["emb_ln_b"])                # (B*S, H) f32

    if attention_mask is None:
        attention_mask = jnp.ones((B, S), jnp.int32)
    mask_add = ((1.0 - attention_mask.astype(jnp.float32)) * -10000.0)[:, None, :]  # (B,1,S)

    for layer_params in params["layers"]:
        h = bert_layer(h, mask_add, layer_params, cfg, B, S)

    hidden = h.reshape(B, S, H).astype(jnp.bfloat16)

    # Segment pooling matrix: [CLS] drop folded in by shifting starts by +1 (keeps T = S
    # tile-aligned, no misaligned slice copy). Binary bf16 matrix + exact f32 1/len scale.
    W = wdlens.shape[1]
    lens = wdlens.astype(jnp.int32)
    starts = jnp.cumsum(lens, axis=1) - lens + 1                            # +1 skips [CLS]
    tok = jnp.arange(S, dtype=jnp.int32)[None, None, :]                     # (1, 1, S)
    in_word = (tok >= starts[:, :, None]) & (tok < (starts + lens)[:, :, None])
    pool_mat = in_word.astype(jnp.bfloat16)                                 # (B, W, S)
    inv_len = (1.0 / jnp.maximum(lens, 1).astype(jnp.float32))[:, :, None]  # (B, W, 1)

    return word_pool(pool_mat, hidden, inv_len)                             # (B, W, H)


# ----------------------------- parameters ---------------------------------- #

def init_params(key, cfg):
    H, I, L = cfg["hidden"], cfg["intermediate"], cfg["layers"]
    keys = jax.random.split(key, 4 + L)

    def nrm(k, shape, dtype=jnp.float32):
        return (jax.random.normal(k, shape, jnp.float32) * 0.02).astype(dtype)

    params = {
        "word_emb": nrm(keys[0], (cfg["vocab"], H)),
        "pos_emb": nrm(keys[1], (cfg["max_pos"], H)),
        "type_emb": nrm(keys[2], (cfg["type_vocab"], H)),
        "emb_ln_g": jnp.ones((H,), jnp.float32),
        "emb_ln_b": jnp.zeros((H,), jnp.float32),
        "layers": [],
    }
    for li in range(L):
        lk = jax.random.split(keys[4 + li], 4)
        params["layers"].append({
            # fused Q|K|V weights, stored bf16 (matmul operands); biases/LN params f32
            "qkv_w": nrm(lk[0], (H, 3 * H), jnp.bfloat16),
            "qkv_b": jnp.zeros((3 * H,), jnp.float32),
            "ao_w": nrm(lk[1], (H, H), jnp.bfloat16),
            "ao_b": jnp.zeros((H,), jnp.float32),
            "ln1_g": jnp.ones((H,), jnp.float32), "ln1_b": jnp.zeros((H,), jnp.float32),
            "i_w": nrm(lk[2], (H, I), jnp.bfloat16), "i_b": jnp.zeros((I,), jnp.float32),
            "o_w": nrm(lk[3], (I, H), jnp.bfloat16), "o_b": jnp.zeros((H,), jnp.float32),
            "ln2_g": jnp.ones((H,), jnp.float32), "ln2_b": jnp.zeros((H,), jnp.float32),
        })
    return params


# ----------------------------- main ----------------------------------------- #

if __name__ == "__main__":
    cfg = dict(vocab=50, hidden=32, layers=2, num_heads=4, intermediate=64,
               max_pos=32, type_vocab=2)

    key = jax.random.PRNGKey(0)
    pkey, ikey = jax.random.split(key)
    params = init_params(pkey, cfg)

    B, tk_seq, wd_seq = 2, 8, 4
    input_ids = jax.random.randint(ikey, (B, tk_seq + 1), 0, cfg["vocab"], dtype=jnp.int32)
    attention_mask = jnp.ones((B, tk_seq + 1), jnp.int32)
    # per-word subword counts; each row sums to tk_seq
    wdlens = jnp.array([[2, 3, 2, 1],
                        [1, 1, 4, 2]], dtype=jnp.int32)

    out = word_bert_forward(params, input_ids, attention_mask, wdlens, cfg)
    out = jax.block_until_ready(out)
    assert out.shape == (B, wd_seq, cfg["hidden"]), out.shape
    assert bool(jnp.all(jnp.isfinite(out)))
    print("KERNEL_OK")
</pallas_src>

<mosaic_0001>
module attributes {stable_mosaic.version = 11 : i64} {
  func.func @_layernorm_kernel(%arg0: i32, %arg1: memref<18x32xf32, #tpu.memory_space<vmem>>, %arg2: memref<1x32xf32, #tpu.memory_space<vmem>>, %arg3: memref<1x32xf32, #tpu.memory_space<vmem>>, %arg4: memref<18x32xf32, #tpu.memory_space<vmem>>) attributes {dimension_semantics = [#tpu.dimension_semantics<parallel>], iteration_bounds = array<i64: 1>, scalar_prefetch = 0 : i64, scratch_operands = 0 : i64, tpu.core_type = #tpu.core_type<tc>, window_params = [{transform_indices = @transform_0, window_bounds = array<i64: 18, 32>}, {pipeline_mode = #tpu.pipeline_mode<synchronous>, transform_indices = @transform_1, window_bounds = array<i64: 1, 32>}, {pipeline_mode = #tpu.pipeline_mode<synchronous>, transform_indices = @transform_2, window_bounds = array<i64: 1, 32>}, {transform_indices = @transform_3, window_bounds = array<i64: 18, 32>}]} {
    %c0 = arith.constant 0 : index
    %c0_0 = arith.constant 0 : index
    %0 = vector.load %arg1[%c0, %c0_0] : memref<18x32xf32, #tpu.memory_space<vmem>>, vector<18x32xf32>
    %c0_1 = arith.constant 0 : index
    %c0_2 = arith.constant 0 : index
    %1 = vector.load %arg2[%c0_1, %c0_2] : memref<1x32xf32, #tpu.memory_space<vmem>>, vector<1x32xf32>
    %c0_3 = arith.constant 0 : index
    %c0_4 = arith.constant 0 : index
    %2 = vector.load %arg3[%c0_3, %c0_4] : memref<1x32xf32, #tpu.memory_space<vmem>>, vector<1x32xf32>
    %cst = arith.constant dense<0.000000e+00> : vector<18xf32>
    %3 = vector.multi_reduction <add>, %0, %cst [1] : vector<18x32xf32> to vector<18xf32>
    %4 = vector.shape_cast %3 : vector<18xf32> to vector<18x1xf32>
    %cst_5 = arith.constant 3.200000e+01 : f32
    %5 = vector.broadcast %cst_5 : f32 to vector<18x1xf32>
    %6 = arith.divf %4, %5 : vector<18x1xf32>
    %7 = vector.broadcast %6 : vector<18x1xf32> to vector<18x32xf32>
    %8 = arith.subf %0, %7 : vector<18x32xf32>
    %9 = arith.mulf %8, %8 : vector<18x32xf32>
    %cst_6 = arith.constant dense<0.000000e+00> : vector<18xf32>
    %10 = vector.multi_reduction <add>, %9, %cst_6 [1] : vector<18x32xf32> to vector<18xf32>
    %11 = vector.shape_cast %10 : vector<18xf32> to vector<18x1xf32>
    %cst_7 = arith.constant 3.200000e+01 : f32
    %12 = vector.broadcast %cst_7 : f32 to vector<18x1xf32>
    %13 = arith.divf %11, %12 : vector<18x1xf32>
    %14 = vector.broadcast %6 : vector<18x1xf32> to vector<18x32xf32>
    %15 = arith.subf %0, %14 : vector<18x32xf32>
    %cst_8 = arith.constant 9.99999996E-13 : f32
    %16 = vector.broadcast %cst_8 : f32 to vector<18x1xf32>
    %17 = arith.addf %13, %16 : vector<18x1xf32>
    %18 = math.rsqrt %17 : vector<18x1xf32>
    %19 = vector.broadcast %18 : vector<18x1xf32> to vector<18x32xf32>
    %20 = arith.mulf %15, %19 : vector<18x32xf32>
    %21 = vector.broadcast %1 : vector<1x32xf32> to vector<18x32xf32>
    %22 = arith.mulf %20, %21 : vector<18x32xf32>
    %23 = vector.broadcast %2 : vector<1x32xf32> to vector<18x32xf32>
    %24 = arith.addf %22, %23 : vector<18x32xf32>
    %c0_9 = arith.constant 0 : index
    %c0_10 = arith.constant 0 : index
    %25 = vector.load %arg4[%c0_9, %c0_10] : memref<18x32xf32, #tpu.memory_space<vmem>>, vector<18x32xf32>
    tpu.vector_store %arg4[%c0_9, %c0_10], %24 {strides = array<i32>} : memref<18x32xf32, #tpu.memory_space<vmem>>, vector<18x32xf32>,
    return
  }
  func.func @transform_0(%arg0: i32) -> (i32, i32) {
    %c0_i32 = arith.constant 0 : i32
    %c0_i32_0 = arith.constant 0 : i32
    return %arg0, %c0_i32 : i32, i32
  }
  func.func @transform_1(%arg0: i32) -> (i32, i32) {
    %c0_i32 = arith.constant 0 : i32
    %c0_i32_0 = arith.constant 0 : i32
    %c0_i32_1 = arith.constant 0 : i32
    return %c0_i32, %c0_i32_0 : i32, i32
  }
  func.func @transform_2(%arg0: i32) -> (i32, i32) {
    %c0_i32 = arith.constant 0 : i32
    %c0_i32_0 = arith.constant 0 : i32
    %c0_i32_1 = arith.constant 0 : i32
    return %c0_i32, %c0_i32_0 : i32, i32
  }
  func.func @transform_3(%arg0: i32) -> (i32, i32) {
    %c0_i32 = arith.constant 0 : i32
    %c0_i32_0 = arith.constant 0 : i32
    return %arg0, %c0_i32 : i32, i32
  }
}

</mosaic_0001>

<bundles_post_ra>
// kernel: tpu_custom_call.1
= control target key start
LH: loop header
LB: loop body
LE: loop exit
PB: predicated region body
PF: predicated region fallthrough
CT: control target
= control target key end

     0   :  { %8 = vsyncpa [#allocation3], 0  ;;  %s243_s0 = inlined_call_operand.hbm [shape: f32[18,32], index: 0, kind: input, shape index: {}]   ;;  %s244_s1 = inlined_call_operand.vmem [shape: f32[1,32], index: 1, kind: input, shape index: {}]   ;;  %s245_s2 = inlined_call_operand.vmem [shape: f32[1,32], index: 2, kind: input, shape index: {}]   ;;  %s246_s3 = inlined_call_operand.hbm [shape: f32[18,32], index: 3, kind: output, shape index: {}]  }
   0x1   :  { %9 = vsyncpa [#allocation4], 0  ;;  %s174_s12 = smov [#allocation2]   ;;  %s126_s16 = scalar_lea.hbm %s243_s0, 384 }
   0x2   :  { %s15_s13 = sshll.u32 %s174_s12, 4  ;;  %p127_p0 = scmp.ne.s32.totalorder %s243_s0, %s126_s16  ;;  %s16_s13 = int_to_ptr.vmem [resolvable:$true] %s15_s13 }
   0x3   :  { %p130_p1 = scmp.lt.u32.totalorder %s126_s16, %s243_s0 }
   0x5   :  { %p132_p2 = pnand %p130_p1, %p127_p0 }
   0x7   :  { %135 = shalt.err (!%p132_p2)
}
   0x8   :  { %s136_s21 = scalar_lea.vmem %s16_s13, 384  ;;  %p141_p4 = scmp.lt.s32.totalorder %s16_s13, %s16_s13 }
   0x9   :  { %p137_p3 = scmp.ne.s32.totalorder %s16_s13, %s136_s21  ;;  %p142_p5 = scmp.lt.s32.totalorder %s136_s21, %s136_s21 }
   0xb   :  { %p143_p6 = por %p142_p5, %p141_p4 }
   0xd   :  { %p144_p7 = pnand %p143_p6, %p137_p3 }
   0xf   :  { %147 = shalt.err (!%p144_p7)
}
  0x10   :  { %s175_s22 = smov 128   ;;  %s176_s23 = smov 8  }
  0x11   :  { %21 = dma.hbm_to_vmem [thread:$0]  %s243_s0, 384, %s16_s13, [#allocation3], %s175_s22, %s175_s22, %s176_s23  }
  0x12   :  { %170 = dma.done.wait [#allocation3], 384  }
  0x13   :  { %171 = vsyncadd [#allocation3], 4294966912  ;;  %vm34_vm0 = vcmask 261120   ;;  %vm41_vm1 = vcmask 254976   ;;  %v29_v0 = vld [vmem:[#allocation2] sm:$0xff]  ;;  %v30_v2 = vld [vmem:[#allocation2 + $0x8] sm:$0xff] }
  0x14   :  { %v31_v1 = vld [vmem:[#allocation2 + $0x10] sm:$0x3]  ;;  %v35_v3 = vsel %vm34_vm0, %v29_v0, 0.0  ;;  %v38_v5 = vsel %vm34_vm0, %v30_v2, 0.0  ;;  %v114_v31 = vld [vmem:[%s244_s1] ss:$0 sm:$0xff] }
  0x15   :  { %v42_v4 = vsel %vm41_vm1, %v31_v1, 0.0  ;;  %36 = vadd.xlane.f32.xlu0 %v35_v3  ;;  %v115_v33 = vld [vmem:[%s245_s2] ss:$0 sm:$0xff]  ;;  %s177_s29 = smov [#allocation5]  }
  0x16   :  { %43 = vadd.xlane.f32.xlu1 %v42_v4  ;;  %s102_s30 = sshll.u32 %s177_s29, 4  ;;  %s103_s30 = int_to_ptr.vmem [resolvable:$true] %s102_s30 }
  0x17   :  { %s148_s1 = scalar_lea.vmem %s103_s30, 384  ;;  %p153_p9 = scmp.lt.s32.totalorder %s103_s30, %s103_s30 }
  0x18   :  { %p149_p8 = scmp.ne.s32.totalorder %s103_s30, %s148_s1  ;;  %p154_p10 = scmp.lt.s32.totalorder %s148_s1, %s148_s1 }
  0x19   :  { %39 = vadd.xlane.f32.xlu0 %v38_v5 }
  0x1a   :  { %p155_p11 = por %p154_p10, %p153_p9 }
  0x1c   :  { %p156_p12 = pnand %p155_p11, %p149_p8 }
  0xa2   :  { %v37_v6 = vpop.xlane.xlu0 %36 }
  0xa3   :  { %v44_v7 = vpop.xlane.xlu1 %43  ;;  %v46_v8 = vmul.f32 0.03125, %v37_v6 }
  0xa4   :  { %v48_v9 = vmul.f32 0.03125, %v44_v7 }
  0xa5   :  { %v49_v10 = vsub.f32 %v29_v0, %v46_v8 }
  0xa6   :  { %v51_v11 = vsub.f32 %v31_v1, %v48_v9  ;;  %v40_v12 = vpop.xlane.xlu0 %39 }
  0xa7   :  { %v47_v13 = vmul.f32 0.03125, %v40_v12  ;;  %v52_v14 = vmul.f32 %v49_v10, %v49_v10 }
  0xa8   :  { %v54_v15 = vmul.f32 %v51_v11, %v51_v11 }
  0xa9   :  { %v50_v16 = vsub.f32 %v30_v2, %v47_v13  ;;  %v55_v17 = vsel %vm34_vm0, %v52_v14, 0.0 }
  0xaa   :  { %56 = vadd.xlane.f32.xlu1 %v55_v17  ;;  %v61_v18 = vsel %vm41_vm1, %v54_v15, 0.0 }
  0xab   :  { %v53_v19 = vmul.f32 %v50_v16, %v50_v16 }
  0xad   :  { %v58_v20 = vsel %vm34_vm0, %v53_v19, 0.0 }
  0xae   :  { %62 = vadd.xlane.f32.xlu1 %v61_v18  ;;  %59 = vadd.xlane.f32.xlu0 %v58_v20 }
 0x137   :  { %v57_v21 = vpop.xlane.xlu1 %56 }
 0x138   :  { %v64_v22 = vmul.f32 0.03125, %v57_v21 }
 0x13a   :  { %v67_v23 = vadd.f32 1e-12, %v64_v22 }
 0x13b   :  { %v63_v24 = vpop.xlane.xlu1 %62  ;;  %v60_v25 = vpop.xlane.xlu0 %59 }
 0x13c   :  { %120 = vrsqrt.f32 %v67_v23  ;;  %v66_v26 = vmul.f32 0.03125, %v63_v24  ;;  %v65_v27 = vmul.f32 0.03125, %v60_v25 }
 0x13e   :  { %v69_v28 = vadd.f32 1e-12, %v66_v26  ;;  %v68_v29 = vadd.f32 1e-12, %v65_v27 }
 0x140   :  { %122 = vrsqrt.f32 %v69_v28 }
 0x141   :  { %124 = vrsqrt.f32 %v68_v29 }
 0x146   :  { %v121_v30 = vpop.eup %120 }
 0x147   :  { %v73_v32 = vmul.f32 %v121_v30, %v49_v10 }
 0x149   :  { %v82_v34 = vmul.f32 %v114_v31, %v73_v32 }
 0x14a   :  { %v123_v35 = vpop.eup %122 }
 0x14b   :  { %v125_v36 = vpop.eup %124  ;;  %v75_v37 = vmul.f32 %v123_v35, %v51_v11  ;;  %v91_v38 = vadd.f32 %v115_v33, %v82_v34 }
 0x14c   :  { %v74_v39 = vmul.f32 %v125_v36, %v50_v16 }
 0x14d   :  { %v84_v40 = vmul.f32 %v114_v31, %v75_v37  ;;  %94 = vst.msk [vmem:[#allocation5] sm:$0xff] %vm34_vm0, %v91_v38 }
 0x14e   :  { %v83_v41 = vmul.f32 %v114_v31, %v74_v39 }
 0x14f   :  { %v93_v42 = vadd.f32 %v115_v33, %v84_v40 }
 0x150   :  { %v92_v43 = vadd.f32 %v115_v33, %v83_v41 }
 0x151   :  { %96 = vst.msk [vmem:[#allocation5 + $0x10] sm:$0x3] %vm41_vm1, %v93_v42 }
 0x152   :  { %95 = vst.msk [vmem:[#allocation5 + $0x8] sm:$0xff] %vm34_vm0, %v92_v43 }
 0x153   :  { %159 = shalt.err (!%p156_p12)
}
 0x154   :  { %s160_s5 = scalar_lea.hbm %s246_s3, 384 }
 0x155   :  { %p161_p13 = scmp.ne.s32.totalorder %s246_s3, %s160_s5  ;;  %p164_p0 = scmp.lt.u32.totalorder %s160_s5, %s246_s3 }
 0x157   :  { %p166_p1 = pnand %p164_p0, %p161_p13 }
 0x159   :  { %169 = shalt.err (!%p166_p1)
}
 0x15a   :  { %108 = dma.vmem_to_hbm [thread:$0]  %s103_s30, 384, %s246_s3, [#allocation4], %s175_s22, %s175_s22, %s176_s23  }
 0x15b   :  { %172 = dma.done.wait [#allocation4], 384  }
 0x15c   :  { %173 = vsyncadd [#allocation4], 4294966912 }
 0x15d   :  { %112 = vsyncpa [#allocation3], 1 }
 0x15e   :  { %113 = vsyncpa [#allocation4], 1 }

</bundles_post_ra>
